<compile_context>
chip_gen: v7x
topology: tpu7x:2x2x1
jax: 0.10.0
libtpu: 0.0.40
codegen_flags: <defaults>
</compile_context>

<pallas_src>
import functools

import jax
import jax.numpy as jnp
from jax.experimental import pallas as pl
from jax.experimental.pallas import tpu as pltpu

_SUBLANE = 16    # bf16 sublane packing alignment for M
_LANE = 128      # lane alignment for K / N

# gen -> (tm_target, tn_target, tk_target, vmem_limit_bytes)
_PREFILL_TILES = {
    "v5": (512, 512, 1024, 48 << 20),
    "v6": (1024, 2048, 512, 64 << 20),
    "v7": (512, 1024, 512, 48 << 20),
    "unknown": (512, 1024, 512, 48 << 20),
}
# Small-M / decode path: kernel is weight-bandwidth bound, so maximize the
# streamed weight tile (tk*tn) to amortize per-step overhead.
_DECODE_TILES = {
    "v5": (256, 2048, 1024, 48 << 20),
    "v6": (256, 2048, 1024, 64 << 20),
    "v7": (256, 2048, 1024, 48 << 20),
    "unknown": (256, 2048, 1024, 48 << 20),
}
# TODO(synk): consider pipeline_mode=pl.Buffered(3) on the weight BlockSpec for
# the decode path if the weight DMA is still exposed on real decode shapes.


def _round_up(x: int, m: int) -> int:
    return ((x + m - 1) // m) * m


@functools.lru_cache(maxsize=None)
def _chip_generation() -> str:
    try:
        kind = jax.devices()[0].device_kind.lower()
    except Exception:
        return "unknown"
    for gen in ("v7", "v6", "v5"):
        if gen in kind:
            return gen
    return "unknown"


def _largest_aligned_divisor(dim: int, target: int, align: int) -> int:
    """Largest multiple of `align` that divides `dim` and is <= target.

    `dim` must itself be a multiple of `align`.
    """
    t = (min(target, dim) // align) * align
    while t > align and dim % t != 0:
        t -= align
    return max(t, align)


def _matmul_kernel(x_ref, wt_ref, o_ref, acc_ref):
    k = pl.program_id(2)

    @pl.when(k == 0)
    def _():
        acc_ref[...] = jnp.zeros_like(acc_ref)

    acc_ref[...] += jnp.dot(
        x_ref[...], wt_ref[...], preferred_element_type=jnp.float32
    )

    @pl.when(k == pl.num_programs(2) - 1)
    def _():
        o_ref[...] = acc_ref[...].astype(o_ref.dtype)


def _matmul_bias_kernel(x_ref, wt_ref, b_ref, o_ref, acc_ref):
    k = pl.program_id(2)

    @pl.when(k == 0)
    def _():
        acc_ref[...] = jnp.zeros_like(acc_ref)

    acc_ref[...] += jnp.dot(
        x_ref[...], wt_ref[...], preferred_element_type=jnp.float32
    )

    @pl.when(k == pl.num_programs(2) - 1)
    def _():
        # Bias added exactly once, in f32, on the VPU (off the MXU critical path).
        o_ref[...] = (acc_ref[...] + b_ref[...].astype(jnp.float32)).astype(o_ref.dtype)


def _pallas_matmul_2d(xm, wt, bias2d):
    """xm: (M, K), wt: (K, N) pre-transposed + 128-aligned weight, bias2d: (1, N) or None."""
    M, K = xm.shape
    Kw, N = wt.shape
    assert K == Kw, (K, Kw)
    assert K % _LANE == 0 and N % _LANE == 0, (K, N)

    gen = _chip_generation()
    Mp = _round_up(M, _SUBLANE)
    decode = Mp <= 256
    tm_t, tn_t, tk_t, vmem_limit = (_DECODE_TILES if decode else _PREFILL_TILES)[gen]

    # M tile: aligned divisor of the (cheaply) 16-padded M; if the divisor
    # structure is pathological, pad M a bit further to keep a large tile.
    tm = _largest_aligned_divisor(Mp, tm_t, _SUBLANE)
    if tm < 128 and Mp > 128:
        tm = min(tm_t, 256)
        Mp = _round_up(Mp, tm)

    # K / N tiles: aligned divisors (weight is already 128-aligned, so waste <128/dim).
    tn = _largest_aligned_divisor(N, tn_t, _LANE)
    tk = _largest_aligned_divisor(K, tk_t, _LANE)

    # v7x has 2 TensorCores sharded over the 'parallel' axes: make sure at least
    # one of them has >= 2 blocks so a core is never idle.
    if gen == "v7" and Mp // tm == 1 and N // tn == 1 and tn > _LANE:
        tn = _largest_aligned_divisor(N, tn // 2, _LANE)

    if Mp != M:
        xm = jnp.pad(xm, ((0, Mp - M), (0, 0)))

    grid = (Mp // tm, N // tn, K // tk)

    in_specs = [
        pl.BlockSpec((tm, tk), lambda i, j, k: (i, k)),
        pl.BlockSpec((tk, tn), lambda i, j, k: (k, j)),
    ]
    operands = [xm, wt]
    kernel = _matmul_kernel
    if bias2d is not None:
        in_specs.append(pl.BlockSpec((1, tn), lambda i, j, k: (0, j)))
        operands.append(bias2d)
        kernel = _matmul_bias_kernel

    cost = pl.CostEstimate(
        flops=2 * Mp * N * K,
        transcendentals=0,
        bytes_accessed=2 * (Mp * K + K * N + Mp * N),  # bf16 operands/result
    )

    out = pl.pallas_call(
        kernel,
        out_shape=jax.ShapeDtypeStruct((Mp, N), xm.dtype),
        grid_spec=pltpu.PrefetchScalarGridSpec(
            num_scalar_prefetch=0,
            grid=grid,
            in_specs=in_specs,
            out_specs=pl.BlockSpec((tm, tn), lambda i, j, k: (i, j)),
            scratch_shapes=[pltpu.VMEM((tm, tn), jnp.float32)],
        ),
        compiler_params=pltpu.CompilerParams(
            dimension_semantics=("parallel", "parallel", "arbitrary"),
            vmem_limit_bytes=vmem_limit,
        ),
        cost_estimate=cost,
    )(*operands)

    if Mp != M:
        out = out[:M]
    return out


@functools.partial(jax.jit, static_argnames=("n_out",))
def _forward_nobias(x, wt_padded, n_out):
    lead = x.shape[:-1]
    K = x.shape[-1]
    Kp = wt_padded.shape[0]
    xm = x.reshape(-1, K)
    if Kp != K:
        xm = jnp.pad(xm, ((0, 0), (0, Kp - K)))
    y2d = _pallas_matmul_2d(xm, wt_padded, None)
    return y2d[:, :n_out].reshape(*lead, n_out)


@functools.partial(jax.jit, static_argnames=("n_out",))
def _forward_bias(x, wt_padded, bias2d_padded, n_out):
    lead = x.shape[:-1]
    K = x.shape[-1]
    Kp = wt_padded.shape[0]
    xm = x.reshape(-1, K)
    if Kp != K:
        xm = jnp.pad(xm, ((0, 0), (0, Kp - K)))
    y2d = _pallas_matmul_2d(xm, wt_padded, bias2d_padded)
    return y2d[:, :n_out].reshape(*lead, n_out)


def column_parallel_linear(x, weight_t_padded, bias2d_padded, n_out):
    """y = x @ weight_t (+ bias).  weight_t_padded: (Kp, Np) pre-transposed, 128-aligned."""
    if bias2d_padded is not None:
        return _forward_bias(x, weight_t_padded, bias2d_padded, n_out=n_out)
    return _forward_nobias(x, weight_t_padded, n_out=n_out)


class ColumnParallelLinearPallas:
    """world_size = 1, so part_out_features == out_features. bf16 weights -> F.linear path."""

    def __init__(self, in_features, out_features, bias=False, dtype=jnp.bfloat16, key=None):
        world_size = 1
        assert out_features % world_size == 0
        self.part_out_features = out_features // world_size
        self.in_features = in_features
        key = key if key is not None else jax.random.PRNGKey(0)
        kw, kb = jax.random.split(key)
        # deterministic synthetic init (module uses torch.empty; we fill with small normals)
        self.weight = (
            jax.random.normal(kw, (self.part_out_features, in_features), jnp.float32)
            * (1.0 / in_features**0.5)
        ).astype(dtype)

        # Pre-transpose AND pre-pad to 128-aligned (Kp, Np) ONCE at construction:
        # the forward path never re-pads or re-transposes the weight in HBM.
        Kp = _round_up(in_features, _LANE)
        Np = _round_up(self.part_out_features, _LANE)
        wt = jnp.asarray(self.weight.T)  # (K, N)
        self.weight_t = jnp.pad(
            wt, ((0, Kp - in_features), (0, Np - self.part_out_features))
        )

        if bias:
            self.bias = (
                jax.random.normal(kb, (self.part_out_features,), jnp.float32) * 0.01
            ).astype(dtype)
            self.bias2d = jnp.pad(
                self.bias, (0, Np - self.part_out_features)
            ).reshape(1, Np)
        else:
            self.bias = None
            self.bias2d = None

    def __call__(self, x):
        return column_parallel_linear(
            x, self.weight_t, self.bias2d, self.part_out_features
        )


if __name__ == "__main__":
    key = jax.random.PRNGKey(0)
    k_x, k_m, k_x2, k_m2 = jax.random.split(key, 4)

    def ref(x, w, b):
        out = jnp.einsum("bsk,nk->bsn", x.astype(jnp.float32), w.astype(jnp.float32))
        if b is not None:
            out = out + b.astype(jnp.float32)
        return out.astype(jnp.bfloat16)

    # --- small shapes (exercise K/N alignment padding + decode path), bias off/on ---
    batch, seq, in_features, out_features = 2, 8, 32, 64
    x = jax.random.normal(k_x, (batch, seq, in_features), jnp.float32).astype(jnp.bfloat16)

    layer = ColumnParallelLinearPallas(in_features, out_features, bias=False, key=k_m)
    layer_b = ColumnParallelLinearPallas(in_features, out_features, bias=True, key=k_m)

    y = layer(x)
    y_b = layer_b(x)
    jax.block_until_ready((y, y_b))

    r = ref(x, layer.weight, None)
    r_b = ref(x, layer_b.weight, layer_b.bias)

    assert y.shape == (batch, seq, out_features) and y.dtype == jnp.bfloat16
    assert jnp.allclose(y.astype(jnp.float32), r.astype(jnp.float32), atol=2e-2, rtol=2e-2)
    assert jnp.allclose(y_b.astype(jnp.float32), r_b.astype(jnp.float32), atol=2e-2, rtol=2e-2)

    # --- larger shapes (exercise multi-tile grid + K reduction accumulator, K=640 not
    #     a 512-multiple -> checks divisor-based tk selection with no over-padding) ---
    b2, s2, in2, out2 = 2, 384, 640, 1024
    x2 = jax.random.normal(k_x2, (b2, s2, in2), jnp.float32).astype(jnp.bfloat16)
    layer2 = ColumnParallelLinearPallas(in2, out2, bias=True, key=k_m2)
    y2 = layer2(x2)
    jax.block_until_ready(y2)
    r2 = ref(x2, layer2.weight, layer2.bias)
    err = jnp.max(jnp.abs(y2.astype(jnp.float32) - r2.astype(jnp.float32)))
    rel = err / (jnp.max(jnp.abs(r2.astype(jnp.float32))) + 1e-6)
    assert y2.shape == (b2, s2, out2) and y2.dtype == jnp.bfloat16
    assert rel < 2e-2, f"relative error too high: {rel}"

    print("KERNEL_OK")
</pallas_src>

<mosaic_0001>
module attributes {stable_mosaic.version = 11 : i64} {
  func.func @_matmul_kernel(%arg0: i32, %arg1: i32, %arg2: i32, %arg3: memref<16x128xbf16, #tpu.memory_space<vmem>>, %arg4: memref<128x128xbf16, #tpu.memory_space<vmem>>, %arg5: memref<16x128xbf16, #tpu.memory_space<vmem>>, %arg6: memref<16x128xf32, #tpu.memory_space<vmem>>) attributes {dimension_semantics = [#tpu.dimension_semantics<parallel>, #tpu.dimension_semantics<parallel>, #tpu.dimension_semantics<arbitrary>], iteration_bounds = array<i64: 1, 1, 1>, scalar_prefetch = 0 : i64, scratch_operands = 1 : i64, tpu.core_type = #tpu.core_type<tc>, window_params = [{transform_indices = @transform_0, window_bounds = array<i64: 16, 128>}, {transform_indices = @transform_1, window_bounds = array<i64: 128, 128>}, {transform_indices = @transform_2, window_bounds = array<i64: 16, 128>}]} {
    %c0_i32 = arith.constant 0 : i32
    %0 = arith.cmpi eq, %arg2, %c0_i32 : i32
    %1 = arith.extui %0 : i1 to i32
    %c0_i32_0 = arith.constant 0 : i32
    %2 = arith.cmpi ne, %1, %c0_i32_0 : i32
    scf.if %2 {
      %cst_10 = arith.constant 0.000000e+00 : f32
      %12 = vector.broadcast %cst_10 : f32 to vector<16x128xf32>
      %c0_11 = arith.constant 0 : index
      %c0_12 = arith.constant 0 : index
      %13 = vector.load %arg6[%c0_11, %c0_12] : memref<16x128xf32, #tpu.memory_space<vmem>>, vector<16x128xf32>
      tpu.vector_store %arg6[%c0_11, %c0_12], %12 {strides = array<i32>} : memref<16x128xf32, #tpu.memory_space<vmem>>, vector<16x128xf32>,
    } else {
    }
    %c0 = arith.constant 0 : index
    %c0_1 = arith.constant 0 : index
    %3 = vector.load %arg6[%c0, %c0_1] : memref<16x128xf32, #tpu.memory_space<vmem>>, vector<16x128xf32>
    %c0_2 = arith.constant 0 : index
    %c0_3 = arith.constant 0 : index
    %4 = vector.load %arg3[%c0_2, %c0_3] : memref<16x128xbf16, #tpu.memory_space<vmem>>, vector<16x128xbf16>
    %c0_4 = arith.constant 0 : index
    %c0_5 = arith.constant 0 : index
    %5 = vector.load %arg4[%c0_4, %c0_5] : memref<128x128xbf16, #tpu.memory_space<vmem>>, vector<128x128xbf16>
    %cst = arith.constant dense<0.000000e+00> : vector<16x128xf32>
    %6 = tpu.matmul %4, %5, %cst {dimension_numbers = #tpu.dot_dimension_numbers<[1], [0], [0], [1], [0, 0, 1, 1], [], []>} : vector<16x128xbf16>, vector<128x128xbf16>, vector<16x128xf32> -> vector<16x128xf32>
    %7 = arith.addf %3, %6 : vector<16x128xf32>
    %c0_6 = arith.constant 0 : index
    %c0_7 = arith.constant 0 : index
    %8 = vector.load %arg6[%c0_6, %c0_7] : memref<16x128xf32, #tpu.memory_space<vmem>>, vector<16x128xf32>
    tpu.vector_store %arg6[%c0_6, %c0_7], %7 {strides = array<i32>} : memref<16x128xf32, #tpu.memory_space<vmem>>, vector<16x128xf32>,
    %c0_i32_8 = arith.constant 0 : i32
    %9 = arith.cmpi eq, %arg2, %c0_i32_8 : i32
    %10 = arith.extui %9 : i1 to i32
    %c0_i32_9 = arith.constant 0 : i32
    %11 = arith.cmpi ne, %10, %c0_i32_9 : i32
    scf.if %11 {
      %c0_10 = arith.constant 0 : index
      %c0_11 = arith.constant 0 : index
      %12 = vector.load %arg6[%c0_10, %c0_11] : memref<16x128xf32, #tpu.memory_space<vmem>>, vector<16x128xf32>
      %13 = arith.truncf %12 : vector<16x128xf32> to vector<16x128xbf16>
      %c0_12 = arith.constant 0 : index
      %c0_13 = arith.constant 0 : index
      %14 = vector.load %arg5[%c0_12, %c0_13] : memref<16x128xbf16, #tpu.memory_space<vmem>>, vector<16x128xbf16>
      tpu.vector_store %arg5[%c0_12, %c0_13], %13 {strides = array<i32>} : memref<16x128xbf16, #tpu.memory_space<vmem>>, vector<16x128xbf16>,
    } else {
    }
    return
  }
  func.func @transform_0(%arg0: i32, %arg1: i32, %arg2: i32) -> (i32, i32) {
    %c0_i32 = arith.constant 0 : i32
    return %arg0, %arg2 : i32, i32
  }
  func.func @transform_1(%arg0: i32, %arg1: i32, %arg2: i32) -> (i32, i32) {
    %c0_i32 = arith.constant 0 : i32
    return %arg2, %arg1 : i32, i32
  }
  func.func @transform_2(%arg0: i32, %arg1: i32, %arg2: i32) -> (i32, i32) {
    %c0_i32 = arith.constant 0 : i32
    return %arg0, %arg1 : i32, i32
  }
}

</mosaic_0001>

<bundles_post_ra>
// kernel: _forward_nobias.1
= control target key start
LH: loop header
LB: loop body
LE: loop exit
PB: predicated region body
PF: predicated region fallthrough
CT: control target
= control target key end

     0   :  { %7 = vsyncpa [#allocation4], 0  ;;  %s256_s9 = smov [#allocation3]   ;;  %s294_s0 = inlined_call_operand.vmem [shape: bf16[16,128], index: 0, kind: input, shape index: {}]   ;;  %s295_s1 = inlined_call_operand.hbm [shape: bf16[128,128], index: 1, kind: input, shape index: {}]   ;;  %s296_s2 = inlined_call_operand.vmem [shape: bf16[16,128], index: 2, kind: output, shape index: {}]  }
   0x1   :  { %s15_s10 = sshll.u32 %s256_s9, 4  ;;  %s232_s13 = scalar_lea.hbm %s295_s1, 1024  ;;  %s16_s10 = int_to_ptr.vmem [resolvable:$true] %s15_s10 }
   0x2   :  { %p233_p0 = scmp.ne.s32.totalorder %s295_s1, %s232_s13  ;;  %p236_p1 = scmp.lt.u32.totalorder %s232_s13, %s295_s1 }
   0x4   :  { %p238_p2 = pnand %p236_p1, %p233_p0 }
   0x6   :  { %241 = shalt.err (!%p238_p2)
}
   0x7   :  { %s242_s18 = scalar_lea.vmem %s16_s10, 1024  ;;  %p247_p4 = scmp.lt.s32.totalorder %s16_s10, %s16_s10 }
   0x8   :  { %p243_p3 = scmp.ne.s32.totalorder %s16_s10, %s242_s18  ;;  %p248_p5 = scmp.lt.s32.totalorder %s242_s18, %s242_s18 }
   0xa   :  { %p249_p6 = por %p248_p5, %p247_p4 }
   0xc   :  { %p250_p7 = pnand %p249_p6, %p243_p3 }
   0xe   :  { %253 = shalt.err (!%p250_p7)
}
   0xf   :  { %s257_s19 = smov 64   ;;  %s258_s20 = smov 4  }
  0x10   :  { %21 = dma.hbm_to_vmem [thread:$0]  %s295_s1, 1024, %s16_s10, [#allocation4], %s257_s19, %s257_s19, %s258_s20  }
  0x11   :  { %254 = dma.done.wait [#allocation4], 1024  }
  0x12   :  { %255 = vsyncadd [#allocation4], 4294966272  ;;  %v259_v0 = vmov 0.0   ;;  %vm260_vm0 = vmmov 0   ;;  %v223_v1 = vld [vmem:[#allocation3] sm:$0xff]   ;;  %v224_v2 = vld [vmem:[#allocation3 + $0x8] sm:$0xff]  }
  0x13   :  { %198 = vmatprep.subr.bf16.mxu0 %v259_v0  ;;  %214 = vmatprep.mubr.msk.bf16.mxu0 %vm260_vm0, %v259_v0  ;;  %v225_v3 = vld [vmem:[#allocation3 + $0x10] sm:$0xff]   ;;  %v226_v4 = vld [vmem:[#allocation3 + $0x18] sm:$0xff]   ;;  %v227_v5 = vld [vmem:[#allocation3 + $0x20] sm:$0xff]  }
  0x14   :  { %199 = vmatpush3.bf16.msra.mxu0 %v223_v1  ;;  %v228_v6 = vld [vmem:[#allocation3 + $0x28] sm:$0xff]   ;;  %v229_v7 = vld [vmem:[#allocation3 + $0x30] sm:$0xff]   ;;  %v230_v8 = vld [vmem:[#allocation3 + $0x38] sm:$0xff]  }
  0x15   :  { %200 = vmatprep.subr.bf16.mxu0 %v259_v0  ;;  %v231_v9 = vld [vmem:[%s294_s0] sm:$0xff]  }
  0x18   :  { %201 = vmatpush3.bf16.msra.mxu0 %v224_v2 }
  0x19   :  { %202 = vmatprep.subr.bf16.mxu0 %v259_v0 }
  0x1c   :  { %203 = vmatpush3.bf16.msra.mxu0 %v225_v3 }
  0x1d   :  { %204 = vmatprep.subr.bf16.mxu0 %v259_v0 }
  0x20   :  { %205 = vmatpush3.bf16.msra.mxu0 %v226_v4 }
  0x21   :  { %206 = vmatprep.subr.bf16.mxu0 %v259_v0 }
  0x24   :  { %207 = vmatpush3.bf16.msra.mxu0 %v227_v5 }
  0x25   :  { %208 = vmatprep.subr.bf16.mxu0 %v259_v0 }
  0x28   :  { %209 = vmatpush3.bf16.msra.mxu0 %v228_v6 }
  0x29   :  { %210 = vmatprep.subr.bf16.mxu0 %v259_v0 }
  0x2c   :  { %211 = vmatpush3.bf16.msra.mxu0 %v229_v7 }
  0x2d   :  { %212 = vmatprep.subr.bf16.mxu0 %v259_v0 }
  0x30   :  { %213 = vmatpush3.bf16.msra.mxu0 %v230_v8 }
  0x33   :  { %215 = vmatmul.mubr.bf16.vlgmr.msra.gmra.mrb[0].mxu0 %v231_v9 }
 0x106   :  { %v140_v10 = vpop.f32.mrb[0].mxu0 }
 0x107   :  { %v216_v11 = vpop.f32.mrb[1].mxu0 }
 0x108   :  { %v143_v12 = vpop.f32.mrb[2].mxu0 }
 0x109   :  { %v187_v13 = vpack.c.bf16 %v143_v12, %v140_v10  ;;  %v217_v14 = vpop.f32.mrb[3].mxu0 }
 0x10b   :  { %188 = vst [vmem:[%s296_s2] sm:$0xff] %v187_v13  }
 0x10c   :  { %170 = vsyncpa [#allocation4], 1 }

</bundles_post_ra>
